<compile_context>
chip_gen: v6e
topology: v6e:2x2x1
jax: 0.10.0
libtpu: 0.0.40
codegen_flags: <defaults>
</compile_context>

<pallas_src>
import jax
import jax.numpy as jnp
from jax.experimental import pallas as pl
from jax.experimental.pallas import tpu as pltpu

_SUBLANE = 8      # f32 sublane tile
_LANE = 128       # lane tile


def _round_up(n, m):
    return (n + m - 1) // m * m


def rnn_kernel(x2d_ref, wih_ref, whh_ref, b_ref, wfc_ref, bfc_ref, out_ref):
    # Static shapes (trace-time Python ints).
    TB, I = x2d_ref.shape            # (T*BP, I): time-major, batch padded to BP
    H = whh_ref.shape[0]
    BP, OP = out_ref.shape           # (BP, OP): lane-dense padded output
    T = TB // BP

    # --- Hoisted, non-recurrent input projection for ALL timesteps ----------
    # One (T*BP, I) @ (I, H) MXU matmul + fused RNN bias (b_ih + b_hh).
    pre = (jnp.dot(x2d_ref[...], wih_ref[...],
                   preferred_element_type=jnp.float32)
           + b_ref[...])             # (T*BP, H); timestep t = rows [t*BP, (t+1)*BP)

    # --- Sequential recurrence, hidden state carried in registers -----------
    whh = whh_ref[...]               # W_hh^T, (H, H)
    h = jnp.zeros((BP, H), jnp.float32)
    # Fully unrolled static loop (T is small): one MXU matmul + one EUP tanh
    # per step on the serial critical path.  Each pre slice is a single
    # 8-sublane-aligned vreg (static, tile-aligned slice -> plain vreg pick).
    # Switch to lax.fori_loop(..., unroll=4..8) reading pre from a VMEM
    # scratch via pl.ds if T grows large.
    for t in range(T):
        addend = pre[t * BP:(t + 1) * BP, :]           # static 8-aligned slice
        h = jnp.tanh(jnp.dot(h, whh, preferred_element_type=jnp.float32)
                     + addend)

    # --- Final Linear on the last hidden state (lane-dense padded output) ---
    out_ref[...] = (jnp.dot(h, wfc_ref[...],
                            preferred_element_type=jnp.float32)
                    + bfc_ref[...])


@jax.jit
def rnn_forward(x, w_ih, w_hh, b_ih, b_hh, w_fc, b_fc):
    """x: (B, T, I) float32.  Weights follow PyTorch shapes:
       w_ih (H, I), w_hh (H, H), b_ih (H,), b_hh (H,), w_fc (O, H), b_fc (O,)."""
    B, T, I = x.shape
    H = w_ih.shape[0]
    O = w_fc.shape[0]

    BP = _round_up(max(B, 1), _SUBLANE)   # fill f32 sublanes / MXU rows
    OP = _round_up(max(O, 1), _LANE)      # lane-dense output -> unmasked vst

    # Time-major layout + zero-pad batch to BP so each timestep's block of
    # pre-activations is a contiguous, sublane-aligned row slab.
    x_tm = jnp.transpose(x, (1, 0, 2))                        # (T, B, I)
    x_tm = jnp.pad(x_tm, ((0, 0), (0, BP - B), (0, 0)))       # (T, BP, I)
    x2d = x_tm.reshape(T * BP, I)                             # (T*BP, I)

    wih_t = jnp.transpose(w_ih)                               # (I, H)
    whh_t = jnp.transpose(w_hh)                               # (H, H)
    b_rnn = (b_ih + b_hh).reshape(1, H)                       # (1, H)
    wfc_t = jnp.pad(jnp.transpose(w_fc), ((0, 0), (0, OP - O)))  # (H, OP)
    bfc = jnp.pad(b_fc, (0, OP - O)).reshape(1, OP)           # (1, OP)

    vmem = lambda: pl.BlockSpec(memory_space=pltpu.MemorySpace.VMEM)
    out_padded = pl.pallas_call(
        rnn_kernel,
        out_shape=jax.ShapeDtypeStruct((BP, OP), jnp.float32),
        in_specs=[vmem() for _ in range(6)],    # whole (tiny) problem in VMEM
        out_specs=vmem(),
        # Explicit, conservative VMEM budget: safe on v5e/v6e (128 MiB phys)
        # and within v7x's 64 MiB physical VMEM.
        compiler_params=pltpu.CompilerParams(
            vmem_limit_bytes=32 * 1024 * 1024),
    )(x2d, wih_t, whh_t, b_rnn, wfc_t, bfc)

    return out_padded[:B, :O]


def rnn_reference(x, w_ih, w_hh, b_ih, b_hh, w_fc, b_fc):
    """Pure-JAX reference matching torch semantics (for verification)."""
    B = x.shape[0]
    H = w_ih.shape[0]
    h0 = jnp.zeros((B, H), jnp.float32)

    def step(h, x_t):
        h_new = jnp.tanh(x_t @ w_ih.T + b_ih + h @ w_hh.T + b_hh)
        return h_new, None

    h_last, _ = jax.lax.scan(step, h0, jnp.transpose(x, (1, 0, 2)))
    return h_last @ w_fc.T + b_fc


if __name__ == "__main__":
    # Small shapes consistent with the module's forward.
    B, T = 2, 8
    input_size, hidden_size, output_size = 16, 50, 10

    key = jax.random.PRNGKey(0)
    ks = jax.random.split(key, 7)
    scale = 1.0 / jnp.sqrt(hidden_size)

    x = jax.random.normal(ks[0], (B, T, input_size), jnp.float32)
    w_ih = jax.random.uniform(ks[1], (hidden_size, input_size), jnp.float32,
                              -scale, scale)
    w_hh = jax.random.uniform(ks[2], (hidden_size, hidden_size), jnp.float32,
                              -scale, scale)
    b_ih = jax.random.uniform(ks[3], (hidden_size,), jnp.float32, -scale, scale)
    b_hh = jax.random.uniform(ks[4], (hidden_size,), jnp.float32, -scale, scale)
    w_fc = jax.random.uniform(ks[5], (output_size, hidden_size), jnp.float32,
                              -scale, scale)
    b_fc = jax.random.uniform(ks[6], (output_size,), jnp.float32, -scale, scale)

    out = rnn_forward(x, w_ih, w_hh, b_ih, b_hh, w_fc, b_fc)
    out = jax.block_until_ready(out)

    ref = rnn_reference(x, w_ih, w_hh, b_ih, b_hh, w_fc, b_fc)
    assert out.shape == (B, output_size)
    assert jnp.allclose(out, ref, atol=1e-5, rtol=1e-5), "mismatch vs reference"

    print("KERNEL_OK")
</pallas_src>

<mosaic_0001>
module attributes {stable_mosaic.version = 11 : i64} {
  func.func @rnn_kernel(%arg0: memref<64x16xf32, #tpu.memory_space<vmem>>, %arg1: memref<16x50xf32, #tpu.memory_space<vmem>>, %arg2: memref<50x50xf32, #tpu.memory_space<vmem>>, %arg3: memref<1x50xf32, #tpu.memory_space<vmem>>, %arg4: memref<50x128xf32, #tpu.memory_space<vmem>>, %arg5: memref<1x128xf32, #tpu.memory_space<vmem>>, %arg6: memref<8x128xf32, #tpu.memory_space<vmem>>) attributes {dimension_semantics = [], scalar_prefetch = 0 : i64, scratch_operands = 0 : i64, tpu.core_type = #tpu.core_type<tc>} {
    %c0 = arith.constant 0 : index
    %c0_0 = arith.constant 0 : index
    %0 = vector.load %arg0[%c0, %c0_0] : memref<64x16xf32, #tpu.memory_space<vmem>>, vector<64x16xf32>
    %c0_1 = arith.constant 0 : index
    %c0_2 = arith.constant 0 : index
    %1 = vector.load %arg1[%c0_1, %c0_2] : memref<16x50xf32, #tpu.memory_space<vmem>>, vector<16x50xf32>
    %cst = arith.constant dense<0.000000e+00> : vector<64x50xf32>
    %2 = tpu.matmul %0, %1, %cst {dimension_numbers = #tpu.dot_dimension_numbers<[1], [0], [0], [1], [0, 0, 1, 1], [], []>} : vector<64x16xf32>, vector<16x50xf32>, vector<64x50xf32> -> vector<64x50xf32>
    %c0_3 = arith.constant 0 : index
    %c0_4 = arith.constant 0 : index
    %3 = vector.load %arg3[%c0_3, %c0_4] : memref<1x50xf32, #tpu.memory_space<vmem>>, vector<1x50xf32>
    %4 = vector.broadcast %3 : vector<1x50xf32> to vector<64x50xf32>
    %5 = arith.addf %2, %4 : vector<64x50xf32>
    %c0_5 = arith.constant 0 : index
    %c0_6 = arith.constant 0 : index
    %6 = vector.load %arg2[%c0_5, %c0_6] : memref<50x50xf32, #tpu.memory_space<vmem>>, vector<50x50xf32>
    %cst_7 = arith.constant 0.000000e+00 : f32
    %7 = vector.broadcast %cst_7 : f32 to vector<8x50xf32>
    %8 = vector.extract_strided_slice %5 {offsets = [0, 0], sizes = [8, 50], strides = [1, 1]} : vector<64x50xf32> to vector<8x50xf32>
    %cst_8 = arith.constant dense<0.000000e+00> : vector<8x50xf32>
    %9 = tpu.matmul %7, %6, %cst_8 {dimension_numbers = #tpu.dot_dimension_numbers<[1], [0], [0], [1], [0, 0, 1, 1], [], []>} : vector<8x50xf32>, vector<50x50xf32>, vector<8x50xf32> -> vector<8x50xf32>
    %10 = arith.addf %9, %8 : vector<8x50xf32>
    %11 = math.tanh %10 : vector<8x50xf32>
    %12 = vector.extract_strided_slice %5 {offsets = [8, 0], sizes = [8, 50], strides = [1, 1]} : vector<64x50xf32> to vector<8x50xf32>
    %cst_9 = arith.constant dense<0.000000e+00> : vector<8x50xf32>
    %13 = tpu.matmul %11, %6, %cst_9 {dimension_numbers = #tpu.dot_dimension_numbers<[1], [0], [0], [1], [0, 0, 1, 1], [], []>} : vector<8x50xf32>, vector<50x50xf32>, vector<8x50xf32> -> vector<8x50xf32>
    %14 = arith.addf %13, %12 : vector<8x50xf32>
    %15 = math.tanh %14 : vector<8x50xf32>
    %16 = vector.extract_strided_slice %5 {offsets = [16, 0], sizes = [8, 50], strides = [1, 1]} : vector<64x50xf32> to vector<8x50xf32>
    %cst_10 = arith.constant dense<0.000000e+00> : vector<8x50xf32>
    %17 = tpu.matmul %15, %6, %cst_10 {dimension_numbers = #tpu.dot_dimension_numbers<[1], [0], [0], [1], [0, 0, 1, 1], [], []>} : vector<8x50xf32>, vector<50x50xf32>, vector<8x50xf32> -> vector<8x50xf32>
    %18 = arith.addf %17, %16 : vector<8x50xf32>
    %19 = math.tanh %18 : vector<8x50xf32>
    %20 = vector.extract_strided_slice %5 {offsets = [24, 0], sizes = [8, 50], strides = [1, 1]} : vector<64x50xf32> to vector<8x50xf32>
    %cst_11 = arith.constant dense<0.000000e+00> : vector<8x50xf32>
    %21 = tpu.matmul %19, %6, %cst_11 {dimension_numbers = #tpu.dot_dimension_numbers<[1], [0], [0], [1], [0, 0, 1, 1], [], []>} : vector<8x50xf32>, vector<50x50xf32>, vector<8x50xf32> -> vector<8x50xf32>
    %22 = arith.addf %21, %20 : vector<8x50xf32>
    %23 = math.tanh %22 : vector<8x50xf32>
    %24 = vector.extract_strided_slice %5 {offsets = [32, 0], sizes = [8, 50], strides = [1, 1]} : vector<64x50xf32> to vector<8x50xf32>
    %cst_12 = arith.constant dense<0.000000e+00> : vector<8x50xf32>
    %25 = tpu.matmul %23, %6, %cst_12 {dimension_numbers = #tpu.dot_dimension_numbers<[1], [0], [0], [1], [0, 0, 1, 1], [], []>} : vector<8x50xf32>, vector<50x50xf32>, vector<8x50xf32> -> vector<8x50xf32>
    %26 = arith.addf %25, %24 : vector<8x50xf32>
    %27 = math.tanh %26 : vector<8x50xf32>
    %28 = vector.extract_strided_slice %5 {offsets = [40, 0], sizes = [8, 50], strides = [1, 1]} : vector<64x50xf32> to vector<8x50xf32>
    %cst_13 = arith.constant dense<0.000000e+00> : vector<8x50xf32>
    %29 = tpu.matmul %27, %6, %cst_13 {dimension_numbers = #tpu.dot_dimension_numbers<[1], [0], [0], [1], [0, 0, 1, 1], [], []>} : vector<8x50xf32>, vector<50x50xf32>, vector<8x50xf32> -> vector<8x50xf32>
    %30 = arith.addf %29, %28 : vector<8x50xf32>
    %31 = math.tanh %30 : vector<8x50xf32>
    %32 = vector.extract_strided_slice %5 {offsets = [48, 0], sizes = [8, 50], strides = [1, 1]} : vector<64x50xf32> to vector<8x50xf32>
    %cst_14 = arith.constant dense<0.000000e+00> : vector<8x50xf32>
    %33 = tpu.matmul %31, %6, %cst_14 {dimension_numbers = #tpu.dot_dimension_numbers<[1], [0], [0], [1], [0, 0, 1, 1], [], []>} : vector<8x50xf32>, vector<50x50xf32>, vector<8x50xf32> -> vector<8x50xf32>
    %34 = arith.addf %33, %32 : vector<8x50xf32>
    %35 = math.tanh %34 : vector<8x50xf32>
    %36 = vector.extract_strided_slice %5 {offsets = [56, 0], sizes = [8, 50], strides = [1, 1]} : vector<64x50xf32> to vector<8x50xf32>
    %cst_15 = arith.constant dense<0.000000e+00> : vector<8x50xf32>
    %37 = tpu.matmul %35, %6, %cst_15 {dimension_numbers = #tpu.dot_dimension_numbers<[1], [0], [0], [1], [0, 0, 1, 1], [], []>} : vector<8x50xf32>, vector<50x50xf32>, vector<8x50xf32> -> vector<8x50xf32>
    %38 = arith.addf %37, %36 : vector<8x50xf32>
    %39 = math.tanh %38 : vector<8x50xf32>
    %c0_16 = arith.constant 0 : index
    %c0_17 = arith.constant 0 : index
    %40 = vector.load %arg4[%c0_16, %c0_17] : memref<50x128xf32, #tpu.memory_space<vmem>>, vector<50x128xf32>
    %cst_18 = arith.constant dense<0.000000e+00> : vector<8x128xf32>
    %41 = tpu.matmul %39, %40, %cst_18 {dimension_numbers = #tpu.dot_dimension_numbers<[1], [0], [0], [1], [0, 0, 1, 1], [], []>} : vector<8x50xf32>, vector<50x128xf32>, vector<8x128xf32> -> vector<8x128xf32>
    %c0_19 = arith.constant 0 : index
    %c0_20 = arith.constant 0 : index
    %42 = vector.load %arg5[%c0_19, %c0_20] : memref<1x128xf32, #tpu.memory_space<vmem>>, vector<1x128xf32>
    %43 = vector.broadcast %42 : vector<1x128xf32> to vector<8x128xf32>
    %44 = arith.addf %41, %43 : vector<8x128xf32>
    %c0_21 = arith.constant 0 : index
    %c0_22 = arith.constant 0 : index
    %45 = vector.load %arg6[%c0_21, %c0_22] : memref<8x128xf32, #tpu.memory_space<vmem>>, vector<8x128xf32>
    tpu.vector_store %arg6[%c0_21, %c0_22], %44 {strides = array<i32>} : memref<8x128xf32, #tpu.memory_space<vmem>>, vector<8x128xf32>,
    return
  }
}

</mosaic_0001>

<bundles_post_ra>
// kernel: rnn_forward.1
= control target key start
LH: loop header
LB: loop body
LE: loop exit
PB: predicated region body
PF: predicated region fallthrough
CT: control target
= control target key end

     0   :  { %vm181_vm0 = vcmask 1041408   ;;  %v1165_v0 = vmov 0.0   ;;  %vm1166_vm1 = vmmov 0   ;;  %vm40_vm2 = vcmask 130048   ;;  %s1482_s2 = inlined_call_operand.vmem [shape: f32[50,50], index: 2, kind: input, shape index: {}]   ;;  %s1483_s1 = inlined_call_operand.vmem [shape: f32[16,50], index: 1, kind: input, shape index: {}]   ;;  %s1484_s0 = inlined_call_operand.vmem [shape: f32[64,16], index: 0, kind: input, shape index: {}]   ;;  %s1485_s3 = inlined_call_operand.vmem [shape: f32[1,50], index: 3, kind: input, shape index: {}]   ;;  %s1486_s4 = inlined_call_operand.vmem [shape: f32[50,128], index: 4, kind: input, shape index: {}]   ;;  %s1487_s5 = inlined_call_operand.vmem [shape: f32[1,128], index: 5, kind: input, shape index: {}]   ;;  %s1488_s6 = inlined_call_operand.vmem [shape: f32[8,128], index: 6, kind: output, shape index: {}]  }
   0x1   :  { %994 = vmatprep.subr.mxu1 %v1165_v0  ;;  %v1206_v1 = vld [vmem:[%s1482_s2 + $0x30] sm:$0x3]  ;;  %v1211_v2 = vld [vmem:[%s1482_s2 + $0x28] sm:$0xff]  ;;  %1008 = vmatprep.mubr.msk.f32.mxu1 %vm1166_vm1, %v1165_v0  ;;  %v31_v4 = vld [vmem:[%s1483_s1] sm:$0xff]  ;;  %vm177_vm3 = vcmask 408576  }
   0x2   :  { %v32_v3 = vld [vmem:[%s1483_s1 + $0x8] sm:$0xff]  ;;  %995 = vmatpush3.msk.msra.mxu1 %vm181_vm0, %v1206_v1  ;;  %v1227_v5 = vld [vmem:[%s1482_s2 + $0x20] sm:$0xff]  ;;  %v1240_v8 = vld [vmem:[%s1482_s2 + $0x18] sm:$0xff] }
   0x3   :  { %978 = vmatprep.subr.mxu0 %v32_v3  ;;  %996 = vmatprep.subr.mxu1 %v1165_v0  ;;  %v23_v6 = vld [vmem:[%s1484_s0] sm:$0xff]  ;;  %v24_v7 = vld [vmem:[%s1484_s0 + $0x8] sm:$0xff]  ;;  %v1249_v9 = vld [vmem:[%s1482_s2 + $0x10] sm:$0xff] }
   0x4   :  { %979 = vmatpush3.msra.mxu0 %v32_v3  ;;  %997 = vmatpush3.msra.mxu1 %v1211_v2  ;;  %v1257_v10 = vld [vmem:[%s1482_s2 + $0x8] sm:$0xff]  ;;  %v1267_v11 = vld [vmem:[%s1482_s2] sm:$0xff]  ;;  %v25_v12 = vld [vmem:[%s1484_s0 + $0x10] sm:$0xff] }
   0x5   :  { %980 = vmatprep.subr.mxu0 %v31_v4  ;;  %998 = vmatprep.subr.mxu1 %v1165_v0  ;;  %v26_v13 = vld [vmem:[%s1484_s0 + $0x18] sm:$0xff]  ;;  %v27_v14 = vld [vmem:[%s1484_s0 + $0x20] sm:$0xff]  ;;  %v28_v15 = vld [vmem:[%s1484_s0 + $0x28] sm:$0xff] }
   0x6   :  { %981 = vmatpush3.msra.mxu0 %v31_v4  ;;  %999 = vmatpush3.msra.mxu1 %v1227_v5  ;;  %v29_v16 = vld [vmem:[%s1484_s0 + $0x30] sm:$0xff]  ;;  %v30_v17 = vld [vmem:[%s1484_s0 + $0x38] sm:$0xff]  ;;  %v1332_v19 = vld [vmem:[%s1485_s3] ss:$0 sm:$0xff] }
   0x7   :  { %982 = vmatprep.mubr.msk.f32.mxu0 %vm40_vm2, %v23_v6  ;;  %1000 = vmatprep.subr.mxu1 %v1165_v0  ;;  %v780_v62 = vld [vmem:[%s1486_s4 + $0x30] sm:$0x3]  ;;  %v779_v63 = vld [vmem:[%s1486_s4 + $0x28] sm:$0xff] }
   0x8   :  { %983 = vmatmul.mubr.msk.f32.vlgmr.msra.gmra.mxu0 %vm40_vm2, %v24_v7  ;;  %1001 = vmatpush3.msra.mxu1 %v1240_v8  ;;  %v776_v3 = vld [vmem:[%s1486_s4 + $0x10] sm:$0xff]  ;;  %v775_v4 = vld [vmem:[%s1486_s4 + $0x8] sm:$0xff] }
   0x9   :  { %1011 = vmatprep.subr.mxu0 %v1165_v0  ;;  %1002 = vmatprep.subr.mxu1 %v1165_v0 }
   0xa   :  { %1012 = vmatpush3.msk.msra.mxu0 %vm181_vm0, %v1206_v1  ;;  %1003 = vmatpush3.msra.mxu1 %v1249_v9 }
   0xb   :  { %1013 = vmatprep.subr.mxu0 %v1165_v0  ;;  %1004 = vmatprep.subr.mxu1 %v1165_v0 }
   0xc   :  { %1014 = vmatpush3.msra.mxu0 %v1211_v2  ;;  %1005 = vmatpush3.msra.mxu1 %v1257_v10 }
   0xd   :  { %1015 = vmatprep.subr.mxu0 %v1165_v0  ;;  %1006 = vmatprep.subr.mxu1 %v1165_v0 }
   0xe   :  { %1016 = vmatpush3.msra.mxu0 %v1227_v5  ;;  %1007 = vmatpush3.msra.mxu1 %v1267_v11 }
   0xf   :  { %1017 = vmatprep.subr.mxu0 %v1165_v0  ;;  %1009 = vmatmul.mubr.f32.vlgmr.msra.gmra.mxu1 %v1165_v0 }
  0x10   :  { %1018 = vmatpush3.msra.mxu0 %v1240_v8  ;;  %1028 = vmatprep.subr.mxu1 %v1165_v0 }
  0x11   :  { %1019 = vmatprep.subr.mxu0 %v1165_v0  ;;  %1029 = vmatpush3.msk.msra.mxu1 %vm181_vm0, %v1206_v1 }
  0x12   :  { %1020 = vmatpush3.msra.mxu0 %v1249_v9  ;;  %1030 = vmatprep.subr.mxu1 %v1165_v0 }
  0x13   :  { %1021 = vmatprep.subr.mxu0 %v1165_v0  ;;  %1031 = vmatpush3.msra.mxu1 %v1211_v2 }
  0x14   :  { %1022 = vmatpush3.msra.mxu0 %v1257_v10  ;;  %1032 = vmatprep.subr.mxu1 %v1165_v0 }
  0x15   :  { %1023 = vmatprep.subr.mxu0 %v1165_v0  ;;  %1033 = vmatpush3.msra.mxu1 %v1227_v5 }
  0x16   :  { %1024 = vmatpush3.msra.mxu0 %v1267_v11  ;;  %1034 = vmatprep.subr.mxu1 %v1165_v0 }
  0x17   :  { %1042 = vmatprep.mubr.msk.f32.mxu1 %vm1166_vm1, %v1165_v0  ;;  %1035 = vmatpush3.msra.mxu1 %v1240_v8 }
  0x18   :  { %1045 = vmatprep.subr.mxu0 %v1165_v0  ;;  %1036 = vmatprep.subr.mxu1 %v1165_v0 }
  0x19   :  { %1037 = vmatpush3.msra.mxu1 %v1249_v9  ;;  %985 = vmatprep.mubr.msk.f32.mxu0 %vm40_vm2, %v25_v12 }
  0x1a   :  { %1038 = vmatprep.subr.mxu1 %v1165_v0  ;;  %986 = vmatmul.mubr.msk.f32.gmra.mxu0 %vm40_vm2, %v26_v13 }
  0x1b   :  { %1039 = vmatpush3.msra.mxu1 %v1257_v10  ;;  %988 = vmatprep.mubr.msk.f32.mxu0 %vm40_vm2, %v27_v14 }
  0x1c   :  { %1040 = vmatprep.subr.mxu1 %v1165_v0 }
  0x1d   :  { %1041 = vmatpush3.msra.mxu1 %v1267_v11 }
  0x1e   :  { %1062 = vmatprep.subr.mxu1 %v1165_v0  ;;  %989 = vmatmul.mubr.msk.f32.gmra.mxu0 %vm40_vm2, %v28_v15 }
  0x1f   :  { %991 = vmatprep.mubr.msk.f32.mxu0 %vm40_vm2, %v29_v16 }
  0x22   :  { %992 = vmatmul.mubr.msk.f32.gmra.mxu0 %vm40_vm2, %v30_v17 }
  0x23   :  { %1025 = vmatprep.mubr.msk.f32.mxu0 %vm1166_vm1, %v1165_v0 }
  0xc8   :  { %v984_v18 = vpop.f32.mrf.mxu0 }
  0xc9   :  { %v137_v32 = vadd.f32 %v984_v18, %v1332_v19 }
  0xca   :  { %v131_v20 = vpop.f32.mrf.mxu0 }
  0xcb   :  { %v132_v21 = vadd.f32 %v1332_v19, %v131_v20 }
  0xcf   :  { %v251_v22 = vpop.f32.mrf.mxu1 }
  0xd0   :  { %v252_v23 = vadd.f32 %v251_v22, %v132_v21 }
  0xd1   :  { %v1010_v24 = vpop.f32.mrf.mxu1 }
  0xd2   :  { %1149 = vtanh.f32 %v252_v23 }
  0xda   :  { %v987_v26 = vpop.f32.mrf.mxu0 }
  0xdb   :  { %v147_v42 = vadd.f32 %v987_v26, %v1332_v19 }
  0xdc   :  { %v141_v27 = vpop.f32.mrf.mxu0 }
  0xdd   :  { %v142_v37 = vadd.f32 %v1332_v19, %v141_v27 }
  0xde   :  { %v1353_v28 = vpop.f32.mrf.mxu0 }
  0xdf   :  { %v1150_v25 = vpop.eup %1149  ;;  %v157_v52 = vadd.f32 %v1353_v28, %v1332_v19 }
  0xe0   :  { %1026 = vmatmul.mubr.msk.f32.vlgmr.msra.gmra.mxu0 %vm177_vm3, %v1150_v25  ;;  %v1355_v29 = vpop.f32.mrf.mxu0 }
  0xe1   :  { %1046 = vmatpush3.msk.msra.mxu0 %vm181_vm0, %v1206_v1  ;;  %1059 = vmatprep.mubr.msk.f32.mxu0 %vm1166_vm1, %v1165_v0  ;;  %v152_v47 = vadd.f32 %v1332_v19, %v1355_v29 }
  0xe2   :  { %1047 = vmatprep.subr.mxu0 %v1165_v0  ;;  %v1357_v30 = vpop.f32.mrf.mxu0 }
  0xe3   :  { %1048 = vmatpush3.msra.mxu0 %v1211_v2  ;;  %v167_v6 = vadd.f32 %v1357_v30, %v1332_v19 }
  0xe4   :  { %1049 = vmatprep.subr.mxu0 %v1165_v0  ;;  %v1359_v31 = vpop.f32.mrf.mxu0 }
  0xe5   :  { %1050 = vmatpush3.msra.mxu0 %v1227_v5  ;;  %v162_v57 = vadd.f32 %v1332_v19, %v1359_v31 }
  0xe6   :  { %1051 = vmatprep.subr.mxu0 %v1165_v0 }
  0xe7   :  { %1052 = vmatpush3.msra.mxu0 %v1240_v8 }
  0xe8   :  { %1053 = vmatprep.subr.mxu0 %v1165_v0 }
  0xe9   :  { %1054 = vmatpush3.msra.mxu0 %v1249_v9 }
  0xea   :  { %1055 = vmatprep.subr.mxu0 %v1165_v0 }
  0xeb   :  { %1056 = vmatpush3.msra.mxu0 %v1257_v10 }
  0xec   :  { %1057 = vmatprep.subr.mxu0 %v1165_v0 }
  0xed   :  { %1058 = vmatpush3.msra.mxu0 %v1267_v11 }
  0xee   :  { %1079 = vmatprep.subr.mxu0 %v1165_v0 }
 0x1a0   :  { %v325_v33 = vpop.f32.mrf.mxu0 }
 0x1a1   :  { %v326_v34 = vadd.f32 %v325_v33, %v137_v32 }
 0x1a2   :  { %v1027_v35 = vpop.f32.mrf.mxu0 }
 0x1a3   :  { %1151 = vtanh.f32 %v326_v34 }
 0x1b0   :  { %v1152_v36 = vpop.eup %1151 }
 0x1b1   :  { %1043 = vmatmul.mubr.msk.f32.vlgmr.msra.gmra.mxu1 %vm177_vm3, %v1152_v36 }
 0x1b2   :  { %1063 = vmatpush3.msk.msra.mxu1 %vm181_vm0, %v1206_v1  ;;  %1076 = vmatprep.mubr.msk.f32.mxu1 %vm1166_vm1, %v1165_v0 }
 0x1b3   :  { %1064 = vmatprep.subr.mxu1 %v1165_v0 }
 0x1b4   :  { %1065 = vmatpush3.msra.mxu1 %v1211_v2 }
 0x1b5   :  { %1066 = vmatprep.subr.mxu1 %v1165_v0 }
 0x1b6   :  { %1067 = vmatpush3.msra.mxu1 %v1227_v5 }
 0x1b7   :  { %1068 = vmatprep.subr.mxu1 %v1165_v0 }
 0x1b8   :  { %1069 = vmatpush3.msra.mxu1 %v1240_v8 }
 0x1b9   :  { %1070 = vmatprep.subr.mxu1 %v1165_v0 }
 0x1ba   :  { %1071 = vmatpush3.msra.mxu1 %v1249_v9 }
 0x1bb   :  { %1072 = vmatprep.subr.mxu1 %v1165_v0 }
 0x1bc   :  { %1073 = vmatpush3.msra.mxu1 %v1257_v10 }
 0x1bd   :  { %1074 = vmatprep.subr.mxu1 %v1165_v0 }
 0x1be   :  { %1075 = vmatpush3.msra.mxu1 %v1267_v11 }
 0x1bf   :  { %1096 = vmatprep.subr.mxu1 %v1165_v0 }
 0x271   :  { %v399_v38 = vpop.f32.mrf.mxu1 }
 0x272   :  { %v400_v39 = vadd.f32 %v399_v38, %v142_v37 }
 0x273   :  { %v1044_v40 = vpop.f32.mrf.mxu1 }
 0x274   :  { %1153 = vtanh.f32 %v400_v39 }
 0x281   :  { %v1154_v41 = vpop.eup %1153 }
 0x282   :  { %1060 = vmatmul.mubr.msk.f32.vlgmr.msra.gmra.mxu0 %vm177_vm3, %v1154_v41 }
 0x283   :  { %1080 = vmatpush3.msk.msra.mxu0 %vm181_vm0, %v1206_v1  ;;  %1093 = vmatprep.mubr.msk.f32.mxu0 %vm1166_vm1, %v1165_v0 }
 0x284   :  { %1081 = vmatprep.subr.mxu0 %v1165_v0 }
 0x285   :  { %1082 = vmatpush3.msra.mxu0 %v1211_v2 }
 0x286   :  { %1083 = vmatprep.subr.mxu0 %v1165_v0 }
 0x287   :  { %1084 = vmatpush3.msra.mxu0 %v1227_v5 }
 0x288   :  { %1085 = vmatprep.subr.mxu0 %v1165_v0 }
 0x289   :  { %1086 = vmatpush3.msra.mxu0 %v1240_v8 }
 0x28a   :  { %1087 = vmatprep.subr.mxu0 %v1165_v0 }
 0x28b   :  { %1088 = vmatpush3.msra.mxu0 %v1249_v9 }
 0x28c   :  { %1089 = vmatprep.subr.mxu0 %v1165_v0 }
 0x28d   :  { %1090 = vmatpush3.msra.mxu0 %v1257_v10 }
 0x28e   :  { %1091 = vmatprep.subr.mxu0 %v1165_v0 }
 0x28f   :  { %1092 = vmatpush3.msra.mxu0 %v1267_v11 }
 0x290   :  { %1113 = vmatprep.subr.mxu0 %v1165_v0 }
 0x342   :  { %v473_v43 = vpop.f32.mrf.mxu0 }
 0x343   :  { %v474_v44 = vadd.f32 %v473_v43, %v147_v42 }
 0x344   :  { %v1061_v45 = vpop.f32.mrf.mxu0 }
 0x345   :  { %1155 = vtanh.f32 %v474_v44 }
 0x352   :  { %v1156_v46 = vpop.eup %1155 }
 0x353   :  { %1077 = vmatmul.mubr.msk.f32.vlgmr.msra.gmra.mxu1 %vm177_vm3, %v1156_v46 }
 0x354   :  { %1097 = vmatpush3.msk.msra.mxu1 %vm181_vm0, %v1206_v1  ;;  %1110 = vmatprep.mubr.msk.f32.mxu1 %vm1166_vm1, %v1165_v0 }
 0x355   :  { %1098 = vmatprep.subr.mxu1 %v1165_v0 }
 0x356   :  { %1099 = vmatpush3.msra.mxu1 %v1211_v2 }
 0x357   :  { %1100 = vmatprep.subr.mxu1 %v1165_v0 }
 0x358   :  { %1101 = vmatpush3.msra.mxu1 %v1227_v5 }
 0x359   :  { %1102 = vmatprep.subr.mxu1 %v1165_v0 }
 0x35a   :  { %1103 = vmatpush3.msra.mxu1 %v1240_v8 }
 0x35b   :  { %1104 = vmatprep.subr.mxu1 %v1165_v0 }
 0x35c   :  { %1105 = vmatpush3.msra.mxu1 %v1249_v9 }
 0x35d   :  { %1106 = vmatprep.subr.mxu1 %v1165_v0 }
 0x35e   :  { %1107 = vmatpush3.msra.mxu1 %v1257_v10 }
 0x35f   :  { %1108 = vmatprep.subr.mxu1 %v1165_v0 }
 0x360   :  { %1109 = vmatpush3.msra.mxu1 %v1267_v11 }
 0x361   :  { %1130 = vmatprep.subr.mxu1 %v1165_v0 }
 0x413   :  { %v547_v48 = vpop.f32.mrf.mxu1 }
 0x414   :  { %v548_v49 = vadd.f32 %v547_v48, %v152_v47 }
 0x415   :  { %v1078_v50 = vpop.f32.mrf.mxu1 }
 0x416   :  { %1157 = vtanh.f32 %v548_v49 }
 0x423   :  { %v1158_v51 = vpop.eup %1157 }
 0x424   :  { %1094 = vmatmul.mubr.msk.f32.vlgmr.msra.gmra.mxu0 %vm177_vm3, %v1158_v51 }
 0x425   :  { %1114 = vmatpush3.msk.msra.mxu0 %vm181_vm0, %v1206_v1  ;;  %1127 = vmatprep.mubr.msk.f32.mxu0 %vm1166_vm1, %v1165_v0  ;;  %v778_v1 = vld [vmem:[%s1486_s4 + $0x20] sm:$0xff] }
 0x426   :  { %1115 = vmatprep.subr.mxu0 %v1165_v0 }
 0x427   :  { %1116 = vmatpush3.msra.mxu0 %v1211_v2  ;;  %v777_v2 = vld [vmem:[%s1486_s4 + $0x18] sm:$0xff] }
 0x428   :  { %1117 = vmatprep.subr.mxu0 %v1165_v0 }
 0x429   :  { %1118 = vmatpush3.msra.mxu0 %v1227_v5  ;;  %v774_v5 = vld [vmem:[%s1486_s4] sm:$0xff] }
 0x42a   :  { %1119 = vmatprep.subr.mxu0 %v1165_v0 }
 0x42b   :  { %1120 = vmatpush3.msra.mxu0 %v1240_v8 }
 0x42c   :  { %1121 = vmatprep.subr.mxu0 %v1165_v0 }
 0x42d   :  { %1122 = vmatpush3.msra.mxu0 %v1249_v9 }
 0x42e   :  { %1123 = vmatprep.subr.mxu0 %v1165_v0 }
 0x42f   :  { %1124 = vmatpush3.msra.mxu0 %v1257_v10 }
 0x430   :  { %1125 = vmatprep.subr.mxu0 %v1165_v0 }
 0x431   :  { %1126 = vmatpush3.msra.mxu0 %v1267_v11  ;;  %v893_v11 = vld [vmem:[%s1487_s5] ss:$0 sm:$0xff] }
 0x4e4   :  { %v621_v53 = vpop.f32.mrf.mxu0 }
 0x4e5   :  { %v622_v54 = vadd.f32 %v621_v53, %v157_v52 }
 0x4e6   :  { %v1095_v55 = vpop.f32.mrf.mxu0 }
 0x4e7   :  { %1159 = vtanh.f32 %v622_v54 }
 0x4f4   :  { %v1160_v56 = vpop.eup %1159 }
 0x4f5   :  { %1111 = vmatmul.mubr.msk.f32.vlgmr.msra.gmra.mxu1 %vm177_vm3, %v1160_v56 }
 0x4f6   :  { %1144 = vmatprep.mubr.msk.f32.mxu1 %vm1166_vm1, %v1165_v0  ;;  %1131 = vmatpush3.msk.msra.mxu1 %vm181_vm0, %v780_v62 }
 0x4f7   :  { %1132 = vmatprep.subr.mxu1 %v1165_v0 }
 0x4f8   :  { %1133 = vmatpush3.msra.mxu1 %v779_v63 }
 0x4f9   :  { %1134 = vmatprep.subr.mxu1 %v1165_v0 }
 0x4fa   :  { %1135 = vmatpush3.msra.mxu1 %v778_v1 }
 0x4fb   :  { %1136 = vmatprep.subr.mxu1 %v1165_v0 }
 0x4fc   :  { %1137 = vmatpush3.msra.mxu1 %v777_v2 }
 0x4fd   :  { %1138 = vmatprep.subr.mxu1 %v1165_v0 }
 0x4fe   :  { %1139 = vmatpush3.msra.mxu1 %v776_v3 }
 0x4ff   :  { %1140 = vmatprep.subr.mxu1 %v1165_v0 }
 0x500   :  { %1141 = vmatpush3.msra.mxu1 %v775_v4 }
 0x501   :  { %1142 = vmatprep.subr.mxu1 %v1165_v0 }
 0x502   :  { %1143 = vmatpush3.msra.mxu1 %v774_v5 }
 0x5b5   :  { %v695_v58 = vpop.f32.mrf.mxu1 }
 0x5b6   :  { %v696_v59 = vadd.f32 %v695_v58, %v162_v57 }
 0x5b7   :  { %v1112_v60 = vpop.f32.mrf.mxu1 }
 0x5b8   :  { %1161 = vtanh.f32 %v696_v59 }
 0x5c5   :  { %v1162_v61 = vpop.eup %1161 }
 0x5c6   :  { %1128 = vmatmul.mubr.msk.f32.vlgmr.msra.gmra.mxu0 %vm177_vm3, %v1162_v61 }
 0x686   :  { %v769_v7 = vpop.f32.mrf.mxu0 }
 0x687   :  { %v770_v8 = vadd.f32 %v769_v7, %v167_v6 }
 0x688   :  { %v1129_v9 = vpop.f32.mrf.mxu0 }
 0x689   :  { %1163 = vtanh.f32 %v770_v8 }
 0x696   :  { %v1164_v10 = vpop.eup %1163 }
 0x697   :  { %1145 = vmatmul.mubr.msk.f32.vlgmr.msra.gmra.mxu1 %vm177_vm3, %v1164_v10 }
 0x757   :  { %v860_v12 = vpop.f32.mrf.mxu1 }
 0x758   :  { %v861_v13 = vadd.f32 %v893_v11, %v860_v12 }
 0x759   :  { %v1146_v14 = vpop.f32.mrf.mxu1 }
 0x75a   :  { %864 = vst [vmem:[%s1488_s6] sm:$0xff] %v861_v13 }

</bundles_post_ra>
